<compile_context>
chip_gen: v7x
topology: tpu7x:2x2x1
jax: 0.10.0
libtpu: 0.0.40
codegen_flags: <defaults>
</compile_context>

<pallas_src>
import jax
import jax.numpy as jnp
from jax.experimental import pallas as pl
from jax.experimental.pallas import tpu as pltpu


def _transition_kernel(x_ref, scale_ref, shift_ref, w_ref, pool_ref,
                       out_ref, skip_ref):
    # x_ref:     (Cin, L)   channel-major, batch+spatial flattened into lanes
    #                       (L = N*H*W, lane-dense: multiple of 128)
    # scale_ref: (Cin, 1)   folded BN scale (compute dtype, pre-cast in wrapper)
    # shift_ref: (Cin, 1)   folded BN shift
    # w_ref:     (Cout, Cin) 1x1 conv weight (pre-cast in wrapper)
    # pool_ref:  (L, P)     block-diagonal 2x2 stride-2 avg-pool matrix
    #                       (P = N*Hp*Wp, lane-dense)
    # out_ref:   (Cout, P)  pooled conv output -- full-width unmasked store
    # skip_ref:  (Cin, L)   post-ReLU skip tensor -- full-width unmasked store
    x = x_ref[...].astype(jnp.float32)                            # (Cin, L)

    # BN (folded) + ReLU; this tensor is the skip output.
    skip = jnp.maximum(x * scale_ref[...] + shift_ref[...], 0.0)  # (Cin, L)
    skip_ref[...] = skip.astype(skip_ref.dtype)

    # 1x1 conv == channel matmul with (batch, spatial) kept in lanes.
    z = jnp.dot(w_ref[...], skip,
                preferred_element_type=jnp.float32)               # (Cout, L)

    # 2x2 stride-2 average pool expressed as a matmul (no XLU shuffles).
    out = jnp.dot(z, pool_ref[...],
                  preferred_element_type=jnp.float32)             # (Cout, P)
    out_ref[...] = out.astype(out_ref.dtype)


def transition_with_skip(x_nchw, gamma, beta, mean, var, conv_w_oihw, eps=1e-5):
    """Forward pass of TransitionWithSkip (DenseNet transition), NCHW in/out.

    Returns (out, skip) where skip is the post-ReLU activation.
    """
    N, Cin, H, W = x_nchw.shape
    Cout = conv_w_oihw.shape[0]
    Hp, Wp = H // 2, W // 2
    S, Sp = H * W, Hp * Wp
    L, P = N * S, N * Sp

    # Inference-mode BN folded to per-channel scale/shift (cannot be folded
    # into the conv weight because the post-ReLU tensor is returned as `skip`).
    scale1 = gamma / jnp.sqrt(var + eps)
    shift1 = beta - mean * scale1
    scale = scale1.astype(jnp.float32).reshape(Cin, 1)
    shift = shift1.astype(jnp.float32).reshape(Cin, 1)

    # Channel-major layout: (Cin, N*H*W) so every kernel load/store is
    # lane-dense and the whole batch is one matmul (single grid step).
    x_cm = jnp.transpose(x_nchw, (1, 0, 2, 3)).reshape(Cin, L)

    # Conv weight pre-cast once in the wrapper (no per-step casts in-kernel).
    w2 = conv_w_oihw.reshape(Cout, Cin).astype(jnp.float32)

    # Per-image (S, Sp) pooling matrix: pool[s, p] = 0.25 iff spatial site s
    # falls in pooled window p; block-diagonal over batch -> (L, P).
    h_idx = jnp.arange(H)[:, None]
    w_idx = jnp.arange(W)[None, :]
    pidx = ((h_idx // 2) * Wp + (w_idx // 2)).reshape(S, 1)
    pool_img = (pidx == jnp.arange(Sp)[None, :]).astype(jnp.float32) * 0.25
    pool = jnp.kron(jnp.eye(N, dtype=jnp.float32), pool_img)      # (L, P)

    out2, skip2 = pl.pallas_call(
        _transition_kernel,
        out_shape=(jax.ShapeDtypeStruct((Cout, P), x_nchw.dtype),
                   jax.ShapeDtypeStruct((Cin, L), x_nchw.dtype)),
        grid_spec=pltpu.PrefetchScalarGridSpec(
            num_scalar_prefetch=0,
            grid=(1,),
            in_specs=[
                pl.BlockSpec((Cin, L), lambda i: (0, 0)),
                pl.BlockSpec((Cin, 1), lambda i: (0, 0)),
                pl.BlockSpec((Cin, 1), lambda i: (0, 0)),
                pl.BlockSpec((Cout, Cin), lambda i: (0, 0)),
                pl.BlockSpec((L, P), lambda i: (0, 0)),
            ],
            out_specs=[
                pl.BlockSpec((Cout, P), lambda i: (0, 0)),
                pl.BlockSpec((Cin, L), lambda i: (0, 0)),
            ],
        ),
        compiler_params=pltpu.CompilerParams(
            dimension_semantics=("arbitrary",)),
    )(x_cm, scale, shift, w2, pool)

    # Undo the channel-major lane packing (wrapper-side layout plumbing).
    out = out2.reshape(Cout, N, Hp, Wp).transpose(1, 0, 2, 3)
    skip = skip2.reshape(Cin, N, H, W).transpose(1, 0, 2, 3)
    return out, skip


def _reference(x, gamma, beta, mean, var, w, eps=1e-5):
    """Pure-JAX reference (eval-mode BN), exact f32 elementwise math."""
    N, Cin, H, W = x.shape
    Cout = w.shape[0]
    scale = gamma / jnp.sqrt(var + eps)
    shift = beta - mean * scale
    skip = jnp.maximum(
        x * scale[None, :, None, None] + shift[None, :, None, None], 0.0)
    w2 = w.reshape(Cout, Cin)
    z = (skip[:, None, :, :, :] * w2[None, :, :, None, None]).sum(axis=2)
    out = z.reshape(N, Cout, H // 2, 2, W // 2, 2).mean(axis=(3, 5))
    return out, skip


if __name__ == "__main__":
    # DenseNet transition halves the channel count: Cin=8 -> Cout=4.
    N, Cin, H, W = 2, 8, 16, 16
    Cout = Cin // 2

    key = jax.random.PRNGKey(0)
    ks = jax.random.split(key, 6)
    x = jax.random.normal(ks[0], (N, Cin, H, W), jnp.float32)
    gamma = jax.random.uniform(ks[1], (Cin,), jnp.float32, 0.5, 1.5)
    beta = jax.random.normal(ks[2], (Cin,), jnp.float32) * 0.1
    mean = jax.random.normal(ks[3], (Cin,), jnp.float32) * 0.1
    var = jax.random.uniform(ks[4], (Cin,), jnp.float32, 0.5, 1.5)
    conv_w = jax.random.normal(ks[5], (Cout, Cin, 1, 1), jnp.float32) * 0.2

    out, skip = transition_with_skip(x, gamma, beta, mean, var, conv_w)
    out = jax.block_until_ready(out)
    skip = jax.block_until_ready(skip)

    ref_out, ref_skip = _reference(x, gamma, beta, mean, var, conv_w)
    ref_out = jax.block_until_ready(ref_out)

    assert out.shape == (N, Cout, H // 2, W // 2), out.shape
    assert skip.shape == (N, Cin, H, W), skip.shape
    assert jnp.allclose(skip, ref_skip, atol=1e-4, rtol=1e-4), (
        float(jnp.max(jnp.abs(skip - ref_skip))))
    assert jnp.allclose(out, ref_out, atol=1e-4, rtol=1e-4), (
        float(jnp.max(jnp.abs(out - ref_out))))
    print("KERNEL_OK")
</pallas_src>

<mosaic_0001>
module attributes {stable_mosaic.version = 11 : i64} {
  func.func @_transition_kernel(%arg0: i32, %arg1: memref<8x512xf32, #tpu.memory_space<vmem>>, %arg2: memref<8x1xf32, #tpu.memory_space<vmem>>, %arg3: memref<8x1xf32, #tpu.memory_space<vmem>>, %arg4: memref<4x8xf32, #tpu.memory_space<vmem>>, %arg5: memref<512x128xf32, #tpu.memory_space<vmem>>, %arg6: memref<4x128xf32, #tpu.memory_space<vmem>>, %arg7: memref<8x512xf32, #tpu.memory_space<vmem>>) attributes {dimension_semantics = [#tpu.dimension_semantics<arbitrary>], iteration_bounds = array<i64: 1>, scalar_prefetch = 0 : i64, scratch_operands = 0 : i64, tpu.core_type = #tpu.core_type<tc>, window_params = [{pipeline_mode = #tpu.pipeline_mode<synchronous>, transform_indices = @transform_0, window_bounds = array<i64: 8, 512>}, {pipeline_mode = #tpu.pipeline_mode<synchronous>, transform_indices = @transform_1, window_bounds = array<i64: 8, 1>}, {pipeline_mode = #tpu.pipeline_mode<synchronous>, transform_indices = @transform_2, window_bounds = array<i64: 8, 1>}, {pipeline_mode = #tpu.pipeline_mode<synchronous>, transform_indices = @transform_3, window_bounds = array<i64: 4, 8>}, {pipeline_mode = #tpu.pipeline_mode<synchronous>, transform_indices = @transform_4, window_bounds = array<i64: 512, 128>}, {pipeline_mode = #tpu.pipeline_mode<synchronous>, transform_indices = @transform_5, window_bounds = array<i64: 4, 128>}, {pipeline_mode = #tpu.pipeline_mode<synchronous>, transform_indices = @transform_6, window_bounds = array<i64: 8, 512>}]} {
    %c0 = arith.constant 0 : index
    %c0_0 = arith.constant 0 : index
    %0 = vector.load %arg1[%c0, %c0_0] : memref<8x512xf32, #tpu.memory_space<vmem>>, vector<8x512xf32>
    %c0_1 = arith.constant 0 : index
    %c0_2 = arith.constant 0 : index
    %1 = vector.load %arg2[%c0_1, %c0_2] : memref<8x1xf32, #tpu.memory_space<vmem>>, vector<8x1xf32>
    %2 = vector.broadcast %1 : vector<8x1xf32> to vector<8x512xf32>
    %3 = arith.mulf %0, %2 : vector<8x512xf32>
    %c0_3 = arith.constant 0 : index
    %c0_4 = arith.constant 0 : index
    %4 = vector.load %arg3[%c0_3, %c0_4] : memref<8x1xf32, #tpu.memory_space<vmem>>, vector<8x1xf32>
    %5 = vector.broadcast %4 : vector<8x1xf32> to vector<8x512xf32>
    %6 = arith.addf %3, %5 : vector<8x512xf32>
    %cst = arith.constant 0.000000e+00 : f32
    %7 = vector.broadcast %cst : f32 to vector<8x512xf32>
    %8 = arith.maximumf %6, %7 : vector<8x512xf32>
    %c0_5 = arith.constant 0 : index
    %c0_6 = arith.constant 0 : index
    %9 = vector.load %arg7[%c0_5, %c0_6] : memref<8x512xf32, #tpu.memory_space<vmem>>, vector<8x512xf32>
    tpu.vector_store %arg7[%c0_5, %c0_6], %8 {strides = array<i32>} : memref<8x512xf32, #tpu.memory_space<vmem>>, vector<8x512xf32>,
    %c0_7 = arith.constant 0 : index
    %c0_8 = arith.constant 0 : index
    %10 = vector.load %arg4[%c0_7, %c0_8] : memref<4x8xf32, #tpu.memory_space<vmem>>, vector<4x8xf32>
    %cst_9 = arith.constant dense<0.000000e+00> : vector<4x512xf32>
    %11 = tpu.matmul %10, %8, %cst_9 {dimension_numbers = #tpu.dot_dimension_numbers<[1], [0], [0], [1], [0, 0, 1, 1], [], []>} : vector<4x8xf32>, vector<8x512xf32>, vector<4x512xf32> -> vector<4x512xf32>
    %c0_10 = arith.constant 0 : index
    %c0_11 = arith.constant 0 : index
    %12 = vector.load %arg5[%c0_10, %c0_11] : memref<512x128xf32, #tpu.memory_space<vmem>>, vector<512x128xf32>
    %cst_12 = arith.constant dense<0.000000e+00> : vector<4x128xf32>
    %13 = tpu.matmul %11, %12, %cst_12 {dimension_numbers = #tpu.dot_dimension_numbers<[1], [0], [0], [1], [0, 0, 1, 1], [], []>} : vector<4x512xf32>, vector<512x128xf32>, vector<4x128xf32> -> vector<4x128xf32>
    %c0_13 = arith.constant 0 : index
    %c0_14 = arith.constant 0 : index
    %14 = vector.load %arg6[%c0_13, %c0_14] : memref<4x128xf32, #tpu.memory_space<vmem>>, vector<4x128xf32>
    tpu.vector_store %arg6[%c0_13, %c0_14], %13 {strides = array<i32>} : memref<4x128xf32, #tpu.memory_space<vmem>>, vector<4x128xf32>,
    return
  }
  func.func @transform_0(%arg0: i32) -> (i32, i32) {
    %c0_i32 = arith.constant 0 : i32
    %c0_i32_0 = arith.constant 0 : i32
    %c0_i32_1 = arith.constant 0 : i32
    return %c0_i32, %c0_i32_0 : i32, i32
  }
  func.func @transform_1(%arg0: i32) -> (i32, i32) {
    %c0_i32 = arith.constant 0 : i32
    %c0_i32_0 = arith.constant 0 : i32
    %c0_i32_1 = arith.constant 0 : i32
    return %c0_i32, %c0_i32_0 : i32, i32
  }
  func.func @transform_2(%arg0: i32) -> (i32, i32) {
    %c0_i32 = arith.constant 0 : i32
    %c0_i32_0 = arith.constant 0 : i32
    %c0_i32_1 = arith.constant 0 : i32
    return %c0_i32, %c0_i32_0 : i32, i32
  }
  func.func @transform_3(%arg0: i32) -> (i32, i32) {
    %c0_i32 = arith.constant 0 : i32
    %c0_i32_0 = arith.constant 0 : i32
    %c0_i32_1 = arith.constant 0 : i32
    return %c0_i32, %c0_i32_0 : i32, i32
  }
  func.func @transform_4(%arg0: i32) -> (i32, i32) {
    %c0_i32 = arith.constant 0 : i32
    %c0_i32_0 = arith.constant 0 : i32
    %c0_i32_1 = arith.constant 0 : i32
    return %c0_i32, %c0_i32_0 : i32, i32
  }
  func.func @transform_5(%arg0: i32) -> (i32, i32) {
    %c0_i32 = arith.constant 0 : i32
    %c0_i32_0 = arith.constant 0 : i32
    %c0_i32_1 = arith.constant 0 : i32
    return %c0_i32, %c0_i32_0 : i32, i32
  }
  func.func @transform_6(%arg0: i32) -> (i32, i32) {
    %c0_i32 = arith.constant 0 : i32
    %c0_i32_0 = arith.constant 0 : i32
    %c0_i32_1 = arith.constant 0 : i32
    return %c0_i32, %c0_i32_0 : i32, i32
  }
}

</mosaic_0001>

<bundles_post_ra>
// kernel: tpu_custom_call.1
= control target key start
LH: loop header
LB: loop body
LE: loop exit
PB: predicated region body
PF: predicated region fallthrough
CT: control target
= control target key end

     0   :  { %12 = vsyncpa [#allocation3], 0  ;;  %s814_s0 = inlined_call_operand.hbm [shape: f32[8,512], index: 0, kind: input, shape index: {}]   ;;  %s815_s1 = inlined_call_operand.vmem [shape: f32[8,1], index: 1, kind: input, shape index: {}]   ;;  %s816_s2 = inlined_call_operand.vmem [shape: f32[8,1], index: 2, kind: input, shape index: {}]   ;;  %s817_s3 = inlined_call_operand.vmem [shape: f32[4,8], index: 3, kind: input, shape index: {}]   ;;  %s818_s4 = inlined_call_operand.hbm [shape: f32[512,128], index: 4, kind: input, shape index: {}]   ;;  %s819_s5 = inlined_call_operand.hbm [shape: f32[4,128], index: 5, kind: output, shape index: {0}]   ;;  %s820_s6 = inlined_call_operand.hbm [shape: f32[8,512], index: 6, kind: output, shape index: {1}]  }
   0x1   :  { %13 = vsyncpa [#allocation6], 0 }
   0x2   :  { %14 = vsyncpa [#allocation4], 0 }
   0x3   :  { %15 = vsyncpa [#allocation9], 0  ;;  %s705_s21 = smov [#allocation2]   ;;  %s706_s23 = smov [#allocation5]  }
   0x4   :  { %s22_s22 = sshll.u32 %s705_s21, 4  ;;  %s37_s24 = sshll.u32 %s706_s23, 4  ;;  %s23_s22 = int_to_ptr.vmem [resolvable:$true] %s22_s22  ;;  %s748_s24 = int_to_ptr.vmem [resolvable:$true] %s37_s24 }
   0x5   :  { %s609_s27 = scalar_lea.hbm %s814_s0, 512 }
   0x6   :  { %p610_p0 = scmp.ne.s32.totalorder %s814_s0, %s609_s27  ;;  %p613_p1 = scmp.lt.u32.totalorder %s609_s27, %s814_s0 }
   0x8   :  { %p615_p2 = pnand %p613_p1, %p610_p0 }
   0xa   :  { %618 = shalt.err (!%p615_p2)
}
   0xb   :  { %s619_s8 = scalar_lea.vmem %s23_s22, 512  ;;  %p624_p4 = scmp.lt.s32.totalorder %s23_s22, %s23_s22 }
   0xc   :  { %p620_p3 = scmp.ne.s32.totalorder %s23_s22, %s619_s8  ;;  %p625_p5 = scmp.lt.s32.totalorder %s619_s8, %s619_s8 }
   0xe   :  { %p626_p6 = por %p625_p5, %p624_p4 }
  0x10   :  { %p627_p7 = pnand %p626_p6, %p620_p3 }
  0x12   :  { %630 = shalt.err (!%p627_p7)
}
  0x13   :  { %25 = dma.hbm_to_vmem [thread:$0]  %s814_s0, 512, %s23_s22, [#allocation3]  }
  0x14   :  { %s631_s13 = scalar_lea.hbm %s818_s4, 8192 }
  0x15   :  { %p632_p8 = scmp.ne.s32.totalorder %s818_s4, %s631_s13  ;;  %p635_p9 = scmp.lt.u32.totalorder %s631_s13, %s818_s4 }
  0x17   :  { %p637_p10 = pnand %p635_p9, %p632_p8 }
  0x19   :  { %640 = shalt.err (!%p637_p10)
}
  0x1a   :  { %s641_s18 = scalar_lea.vmem %s748_s24, 8192  ;;  %p646_p12 = scmp.lt.s32.totalorder %s748_s24, %s748_s24 }
  0x1b   :  { %p642_p11 = scmp.ne.s32.totalorder %s748_s24, %s641_s18  ;;  %p647_p13 = scmp.lt.s32.totalorder %s641_s18, %s641_s18 }
  0x1d   :  { %p648_p0 = por %p647_p13, %p646_p12 }
  0x1f   :  { %p649_p1 = pnand %p648_p0, %p642_p11 }
  0x21   :  { %652 = shalt.err (!%p649_p1)
}
  0x22   :  { %s707_s0 = smov 128   ;;  %s708_s19 = smov 8  }
  0x23   :  { %43 = dma.hbm_to_vmem [thread:$0]  %s818_s4, 8192, %s748_s24, [#allocation6], %s707_s0, %s707_s0, %s708_s19  }
  0x24   :  { %697 = dma.done.wait [#allocation3], 512  }
  0x25   :  { %698 = vsyncadd [#allocation3], 4294966784 }
  0x26   :  { %699 = dma.done.wait [#allocation6], 8192  }
  0x27   :  { %700 = vsyncadd [#allocation6], 4294959104  ;;  %v709_v0 = vmov 0   ;;  %v54_v1 = vld [vmem:[%s815_s1] sm:$0xff]  ;;  %v710_v3 = vmov 0.0   ;;  %v51_v4 = vld [vmem:[#allocation2 + $0x8] sm:$0xff] }
  0x28   :  { %608 = vset.pattern.permute.xlu0 %v709_v0  ;;  %v64_v2 = vld [vmem:[%s816_s2] sm:$0xff]  ;;  %151 = vmatprep.mubr.f32.mxu0 %v710_v3  ;;  %v53_v6 = vld [vmem:[#allocation2 + $0x18] sm:$0xff]  ;;  %v52_v8 = vld [vmem:[#allocation2 + $0x10] sm:$0xff]  ;;  %vm83_vm0 = vcmask 64512  }
  0x29   :  { %57 = vperm.xlu0 %608, %v54_v1   ;;  %222 = vmatprep.mubr.f32.mxu1 %v710_v3  ;;  %v50_v7 = vld [vmem:[#allocation2] sm:$0xff]  ;;  %v246_v15 = vld [vmem:[#allocation5 + $0x88] sm:$0xff]  ;;  %v247_v26 = vld [vmem:[#allocation5 + $0x90] sm:$0xff] }
  0x2a   :  { %v245_v13 = vld [vmem:[#allocation5 + $0x80] sm:$0xff]  ;;  %v278_v17 = vld [vmem:[#allocation5 + $0x188] sm:$0xff]  ;;  %v248_v27 = vld [vmem:[#allocation5 + $0x98] sm:$0xff] }
  0x2b   :  { %v277_v16 = vld [vmem:[#allocation5 + $0x180] sm:$0xff]  ;;  %v230_v23 = vld [vmem:[#allocation5 + $0x8] sm:$0xff]  ;;  %v279_v32 = vld [vmem:[#allocation5 + $0x190] sm:$0xff]  ;;  %v536_v35 = vpack.c.bf16 %v246_v15, %v245_v13  ;;  %v540_v41 = vpack.c.bf16 %v248_v27, %v247_v26 }
  0x2c   :  { %v229_v22 = vld [vmem:[#allocation5] sm:$0xff]  ;;  %v262_v25 = vld [vmem:[#allocation5 + $0x108] sm:$0xff]  ;;  %v280_v33 = vld [vmem:[#allocation5 + $0x198] sm:$0xff]  ;;  %v568_v36 = vpack.c.bf16 %v278_v17, %v277_v16 }
  0x2d   :  { %67 = vperm.xlu0 %608, %v64_v2   ;;  %v261_v24 = vld [vmem:[#allocation5 + $0x100] sm:$0xff]  ;;  %v538_v37 = vpack.c.bf16 %v230_v23, %v229_v22  ;;  %v231_v39 = vld [vmem:[#allocation5 + $0x10] sm:$0xff]  ;;  %v232_v40 = vld [vmem:[#allocation5 + $0x18] sm:$0xff]  ;;  %v572_v42 = vpack.c.bf16 %v280_v33, %v279_v32 }
  0x2e   :  { %v82_v34 = vld [vmem:[%s817_s3] sm:$0xf]  ;;  %v570_v38 = vpack.c.bf16 %v262_v25, %v261_v24  ;;  %v263_v43 = vld [vmem:[#allocation5 + $0x110] sm:$0xff]  ;;  %v264_v44 = vld [vmem:[#allocation5 + $0x118] sm:$0xff]  ;;  %v542_v49 = vpack.c.bf16 %v232_v40, %v231_v39  ;;  %s711_s3 = smov [#allocation8]  }
  0x2f   :  { %v249_v45 = vld [vmem:[#allocation5 + $0xa0] sm:$0xff]  ;;  %v250_v46 = vld [vmem:[#allocation5 + $0xa8] sm:$0xff]  ;;  %v574_v50 = vpack.c.bf16 %v264_v44, %v263_v43  ;;  %v251_v57 = vld [vmem:[#allocation5 + $0xb0] sm:$0xff]  ;;  %s450_s4 = sshll.u32 %s711_s3, 4  ;;  %s451_s4 = int_to_ptr.vmem [resolvable:$true] %s450_s4 }
  0x30   :  { %v281_v47 = vld [vmem:[#allocation5 + $0x1a0] sm:$0xff]  ;;  %v282_v48 = vld [vmem:[#allocation5 + $0x1a8] sm:$0xff]  ;;  %v544_v53 = vpack.c.bf16 %v250_v46, %v249_v45  ;;  %v252_v58 = vld [vmem:[#allocation5 + $0xb8] sm:$0xff]  ;;  %s653_s24 = scalar_lea.vmem %s451_s4, 512  ;;  %p658_p3 = scmp.lt.s32.totalorder %s451_s4, %s451_s4 }
  0x31   :  { %v233_v51 = vld [vmem:[#allocation5 + $0x20] sm:$0xff]  ;;  %v234_v52 = vld [vmem:[#allocation5 + $0x28] sm:$0xff]  ;;  %v576_v54 = vpack.c.bf16 %v282_v48, %v281_v47  ;;  %v283_v59 = vld [vmem:[#allocation5 + $0x1b0] sm:$0xff]  ;;  %v548_v1 = vpack.c.bf16 %v252_v58, %v251_v57  ;;  %p654_p2 = scmp.ne.s32.totalorder %s451_s4, %s653_s24  ;;  %p659_p4 = scmp.lt.s32.totalorder %s653_s24, %s653_s24 }
  0x32   :  { %v265_v55 = vld [vmem:[#allocation5 + $0x120] sm:$0xff]  ;;  %v266_v56 = vld [vmem:[#allocation5 + $0x128] sm:$0xff]  ;;  %v284_v60 = vld [vmem:[#allocation5 + $0x1b8] sm:$0xff]  ;;  %v546_v61 = vpack.c.bf16 %v234_v52, %v233_v51 }
  0x33   :  { %v578_v62 = vpack.c.bf16 %v266_v56, %v265_v55  ;;  %v235_v63 = vld [vmem:[#allocation5 + $0x30] sm:$0xff]  ;;  %v236_v0 = vld [vmem:[#allocation5 + $0x38] sm:$0xff]  ;;  %v580_v2 = vpack.c.bf16 %v284_v60, %v283_v59  ;;  %v269_v15 = vld [vmem:[#allocation5 + $0x140] sm:$0xff]  ;;  %p660_p5 = por %p659_p4, %p658_p3 }
  0x34   :  { %v267_v3 = vld [vmem:[#allocation5 + $0x130] sm:$0xff]  ;;  %v270_v16 = vld [vmem:[#allocation5 + $0x148] sm:$0xff]  ;;  %v240_v24 = vld [vmem:[#allocation5 + $0x58] sm:$0xff] }
  0x35   :  { %v255_v17 = vld [vmem:[#allocation5 + $0xd0] sm:$0xff]  ;;  %v586_v22 = vpack.c.bf16 %v270_v16, %v269_v15  ;;  %v290_v32 = vld [vmem:[#allocation5 + $0x1e8] sm:$0xff]  ;;  %v273_v39 = vld [vmem:[#allocation5 + $0x160] sm:$0xff]  ;;  %p661_p6 = pnand %p660_p5, %p654_p2 }
  0x36   :  { %v239_v23 = vld [vmem:[#allocation5 + $0x50] sm:$0xff]  ;;  %v274_v40 = vld [vmem:[#allocation5 + $0x168] sm:$0xff]  ;;  %v292_v44 = vld [vmem:[#allocation5 + $0x1f8] sm:$0xff] }
  0x37   :  { %v271_v27 = vld [vmem:[#allocation5 + $0x150] sm:$0xff]  ;;  %v558_v33 = vpack.c.bf16 %v240_v24, %v239_v23  ;;  %v594_v46 = vpack.c.bf16 %v274_v40, %v273_v39 }
  0x38   :  { %v291_v43 = vld [vmem:[#allocation5 + $0x1f0] sm:$0xff] }
  0x39   :  { %v596_v48 = vpack.c.bf16 %v292_v44, %v291_v43  ;;  %v275_v51 = vld [vmem:[#allocation5 + $0x170] sm:$0xff] }
  0xa8   :  { %v58_v5 = vpop.permute.xlu0 %57 }
  0xa9   :  { %v61_v9 = vmul.f32 %v58_v5, %v51_v4  ;;  %v63_v10 = vmul.f32 %v58_v5, %v53_v6  ;;  %v60_v11 = vmul.f32 %v58_v5, %v50_v7  ;;  %v62_v12 = vmul.f32 %v58_v5, %v52_v8  ;;  %v268_v4 = vld [vmem:[#allocation5 + $0x138] sm:$0xff]  ;;  %v253_v5 = vld [vmem:[#allocation5 + $0xc0] sm:$0xff]  ;;  %v254_v6 = vld [vmem:[#allocation5 + $0xc8] sm:$0xff] }
  0xaa   :  { %v285_v7 = vld [vmem:[#allocation5 + $0x1c0] sm:$0xff]  ;;  %v286_v8 = vld [vmem:[#allocation5 + $0x1c8] sm:$0xff]  ;;  %v552_v13 = vpack.c.bf16 %v254_v6, %v253_v5 }
  0xac   :  { %v68_v14 = vpop.permute.xlu0 %67 }
  0xad   :  { %v71_v18 = vadd.f32 %v68_v14, %v61_v9  ;;  %v73_v19 = vadd.f32 %v68_v14, %v63_v10  ;;  %v70_v20 = vadd.f32 %v68_v14, %v60_v11  ;;  %v72_v21 = vadd.f32 %v68_v14, %v62_v12  ;;  %v237_v11 = vld [vmem:[#allocation5 + $0x40] sm:$0xff]  ;;  %v238_v12 = vld [vmem:[#allocation5 + $0x48] sm:$0xff] }
  0xae   :  { %v550_v9 = vpack.c.bf16 %v236_v0, %v235_v63  ;;  %v582_v10 = vpack.c.bf16 %v268_v4, %v267_v3  ;;  %v584_v14 = vpack.c.bf16 %v286_v8, %v285_v7 }
  0xaf   :  { %v75_v28 = vmax.f32 %v71_v18, 0.0  ;;  %v77_v29 = vmax.f32 %v73_v19, 0.0  ;;  %v74_v30 = vmax.f32 %v70_v20, 0.0  ;;  %v76_v31 = vmax.f32 %v72_v21, 0.0  ;;  %v256_v18 = vld [vmem:[#allocation5 + $0xd8] sm:$0xff]  ;;  %v287_v19 = vld [vmem:[#allocation5 + $0x1d0] sm:$0xff] }
  0xb0   :  { %v288_v20 = vld [vmem:[#allocation5 + $0x1d8] sm:$0xff]  ;;  %v554_v21 = vpack.c.bf16 %v238_v12, %v237_v11  ;;  %v556_v25 = vpack.c.bf16 %v256_v18, %v255_v17 }
  0xb1   :  { %79 = vst [vmem:[#allocation8 + $0x8] sm:$0xff] %v75_v28  ;;  %87 = vmatprep.subr.mxu0 %v75_v28  ;;  %81 = vst [vmem:[#allocation8 + $0x18] sm:$0xff] %v77_v29  ;;  %158 = vmatprep.subr.mxu1 %v77_v29  ;;  %v588_v26 = vpack.c.bf16 %v288_v20, %v287_v19  ;;  %v272_v28 = vld [vmem:[#allocation5 + $0x158] sm:$0xff]  ;;  %v257_v29 = vld [vmem:[#allocation5 + $0xe0] sm:$0xff] }
  0xb2   :  { %78 = vst [vmem:[#allocation8] sm:$0xff] %v74_v30  ;;  %80 = vst [vmem:[#allocation8 + $0x10] sm:$0xff] %v76_v31  ;;  %88 = vmatpush1.msra.mxu0 %v74_v30  ;;  %159 = vmatpush1.msra.mxu1 %v76_v31  ;;  %v258_v30 = vld [vmem:[#allocation5 + $0xe8] sm:$0xff]  ;;  %v289_v31 = vld [vmem:[#allocation5 + $0x1e0] sm:$0xff] }
  0xb3   :  { %464 = vmatmul.mubr.msk.f32.vlgmr.msra.gmra.mrb[0].mxu0 %vm83_vm0, %v82_v34  ;;  %465 = vmatmul.mubr.msk.f32.vlgmr.msra.gmra.mrb[0].mxu1 %vm83_vm0, %v82_v34  ;;  %v590_v34 = vpack.c.bf16 %v272_v28, %v271_v27 }
  0xb4   :  { %537 = vmatprep.subr.bf16.mxu0 %v536_v35  ;;  %569 = vmatprep.subr.bf16.mxu1 %v568_v36  ;;  %v241_v35 = vld [vmem:[#allocation5 + $0x60] sm:$0xff]  ;;  %v242_v36 = vld [vmem:[#allocation5 + $0x68] sm:$0xff] }
  0xb5   :  { %539 = vmatpush3.bf16.msra.mxu0 %v538_v37  ;;  %571 = vmatpush3.bf16.msra.mxu1 %v570_v38  ;;  %v560_v37 = vpack.c.bf16 %v258_v30, %v257_v29  ;;  %v592_v38 = vpack.c.bf16 %v290_v32, %v289_v31  ;;  %v562_v45 = vpack.c.bf16 %v242_v36, %v241_v35 }
  0xb6   :  { %541 = vmatprep.subr.bf16.mxu0 %v540_v41  ;;  %573 = vmatprep.subr.bf16.mxu1 %v572_v42  ;;  %v259_v41 = vld [vmem:[#allocation5 + $0xf0] sm:$0xff]  ;;  %v260_v42 = vld [vmem:[#allocation5 + $0xf8] sm:$0xff] }
  0xb7   :  { %v564_v47 = vpack.c.bf16 %v260_v42, %v259_v41 }
  0xb9   :  { %543 = vmatpush3.bf16.msra.mxu0 %v542_v49  ;;  %575 = vmatpush3.bf16.msra.mxu1 %v574_v50  ;;  %v243_v49 = vld [vmem:[#allocation5 + $0x70] sm:$0xff]  ;;  %v244_v50 = vld [vmem:[#allocation5 + $0x78] sm:$0xff] }
  0xba   :  { %545 = vmatprep.subr.bf16.mxu0 %v544_v53  ;;  %577 = vmatprep.subr.bf16.mxu1 %v576_v54  ;;  %v566_v52 = vpack.c.bf16 %v244_v50, %v243_v49  ;;  %v276_v53 = vld [vmem:[#allocation5 + $0x178] sm:$0xff] }
  0xbb   :  { %v598_v54 = vpack.c.bf16 %v276_v53, %v275_v51 }
  0xbd   :  { %547 = vmatpush3.bf16.msra.mxu0 %v546_v61  ;;  %579 = vmatpush3.bf16.msra.mxu1 %v578_v62 }
  0xbe   :  { %549 = vmatprep.subr.bf16.mxu0 %v548_v1  ;;  %581 = vmatprep.subr.bf16.mxu1 %v580_v2 }
  0xc1   :  { %551 = vmatpush3.bf16.msra.mxu0 %v550_v9  ;;  %583 = vmatpush3.bf16.msra.mxu1 %v582_v10 }
  0xc2   :  { %553 = vmatprep.subr.bf16.mxu0 %v552_v13  ;;  %585 = vmatprep.subr.bf16.mxu1 %v584_v14 }
  0xc5   :  { %555 = vmatpush3.bf16.msra.mxu0 %v554_v21  ;;  %587 = vmatpush3.bf16.msra.mxu1 %v586_v22 }
  0xc6   :  { %557 = vmatprep.subr.bf16.mxu0 %v556_v25  ;;  %589 = vmatprep.subr.bf16.mxu1 %v588_v26 }
  0xc9   :  { %559 = vmatpush3.bf16.msra.mxu0 %v558_v33  ;;  %591 = vmatpush3.bf16.msra.mxu1 %v590_v34 }
  0xca   :  { %561 = vmatprep.subr.bf16.mxu0 %v560_v37  ;;  %593 = vmatprep.subr.bf16.mxu1 %v592_v38 }
  0xcd   :  { %563 = vmatpush3.bf16.msra.mxu0 %v562_v45  ;;  %595 = vmatpush3.bf16.msra.mxu1 %v594_v46 }
  0xce   :  { %565 = vmatprep.subr.bf16.mxu0 %v564_v47  ;;  %597 = vmatprep.subr.bf16.mxu1 %v596_v48 }
  0xd1   :  { %567 = vmatpush3.bf16.msra.mxu0 %v566_v52  ;;  %599 = vmatpush3.bf16.msra.mxu1 %v598_v54 }
 0x186   :  { %v153_v55 = vpop.f32.mrb[0].mxu0  ;;  %v224_v56 = vpop.f32.mrb[0].mxu1 }
 0x187   :  { %v155_v57 = vpop.f32.mrb[1].mxu0  ;;  %v226_v58 = vpop.f32.mrb[1].mxu1 }
 0x188   :  { %357 = vmatprep.mubr.f32.mxu0 %v155_v57  ;;  %427 = vmatprep.mubr.f32.mxu1 %v226_v58 }
 0x189   :  { %358 = vmatmul.mubr.f32.vlgmr.msra.gmra.mrb[2].mxu0 %v153_v55  ;;  %428 = vmatmul.mubr.f32.vlgmr.msra.gmra.mrb[2].mxu1 %v224_v56 }
 0x18a   :  { %664 = shalt.err (!%p661_p6)
}
 0x18b   :  { %s665_s29 = scalar_lea.hbm %s820_s6, 512 }
 0x18c   :  { %p666_p7 = scmp.ne.s32.totalorder %s820_s6, %s665_s29  ;;  %p669_p8 = scmp.lt.u32.totalorder %s665_s29, %s820_s6 }
 0x18e   :  { %p671_p9 = pnand %p669_p8, %p666_p7 }
 0x190   :  { %674 = shalt.err (!%p671_p9)
}
 0x191   :  { %453 = dma.vmem_to_hbm [thread:$0]  %s451_s4, 512, %s820_s6, [#allocation9]  }
 0x192   :  { %s712_s12 = smov [#allocation7]  }
 0x193   :  { %s440_s13 = sshll.u32 %s712_s12, 4  ;;  %s441_s13 = int_to_ptr.vmem [resolvable:$true] %s440_s13 }
 0x194   :  { %s675_s14 = scalar_lea.vmem %s441_s13, 64  ;;  %p680_p11 = scmp.lt.s32.totalorder %s441_s13, %s441_s13 }
 0x195   :  { %p676_p10 = scmp.ne.s32.totalorder %s441_s13, %s675_s14  ;;  %p681_p12 = scmp.lt.s32.totalorder %s675_s14, %s675_s14 }
 0x197   :  { %p682_p13 = por %p681_p12, %p680_p11 }
 0x199   :  { %p683_p0 = pnand %p682_p13, %p676_p10 }
 0x25c   :  { %v498_v59 = vpop.f32.mrb[2].mxu0  ;;  %v533_v60 = vpop.f32.mrb[2].mxu1 }
 0x25d   :  { %v499_v61 = vpop.f32.mrb[3].mxu0  ;;  %v534_v62 = vpop.f32.mrb[3].mxu1 }
 0x25e   :  { %v500_v63 = vadd.f32 %v499_v61, %v498_v59  ;;  %v535_v0 = vadd.f32 %v534_v62, %v533_v60 }
 0x260   :  { %v430_v1 = vadd.f32 %v535_v0, %v500_v63 }
 0x262   :  { %433 = vst [vmem:[#allocation7] sm:$0xf] %v430_v1 }
 0x263   :  { %686 = shalt.err (!%p683_p0)
}
 0x264   :  { %s687_s16 = scalar_lea.hbm %s819_s5, 64 }
 0x265   :  { %p688_p1 = scmp.ne.s32.totalorder %s819_s5, %s687_s16  ;;  %p691_p2 = scmp.lt.u32.totalorder %s687_s16, %s819_s5 }
 0x267   :  { %p693_p3 = pnand %p691_p2, %p688_p1 }
 0x269   :  { %696 = shalt.err (!%p693_p3)
}
 0x26a   :  { %443 = dma.vmem_to_hbm [thread:$0]  %s441_s13, 64, %s819_s5, [#allocation4]  }
 0x26b   :  { %701 = dma.done.wait [#allocation4], 64  }
 0x26c   :  { %702 = vsyncadd [#allocation4], 4294967232 }
 0x26d   :  { %703 = dma.done.wait [#allocation9], 512  }
 0x26e   :  { %704 = vsyncadd [#allocation9], 4294966784 }
 0x26f   :  { %460 = vsyncpa [#allocation3], 1 }
 0x270   :  { %461 = vsyncpa [#allocation6], 1 }
 0x271   :  { %462 = vsyncpa [#allocation4], 1 }
 0x272   :  { %463 = vsyncpa [#allocation9], 1 }

</bundles_post_ra>
